<compile_context>
chip_gen: v7x
topology: tpu7x:2x2x1
jax: 0.10.0
libtpu: 0.0.40
codegen_flags: <defaults>
</compile_context>

<pallas_src>
import functools

import jax
import jax.numpy as jnp
from jax import lax
from jax.experimental import pallas as pl
from jax.experimental.pallas import tpu as pltpu


def _round_up(n, m):
    return ((n + m - 1) // m) * m


def mixture_uplift_kernel(ate_ref, x_ref, a_ref, wf_ref, bf_ref,
                          w2_ref, b2_ref, out_ref, *, hidden):
    ate = ate_ref[0, 0]                               # SMEM scalar
    x = x_ref[...]                                    # (TM, D)  f32, natural layout
    a = a_ref[...]                                    # (1, TM)  f32

    # Fused [linear ; linear3]: contract on D -> lane-dense (Hp, TM) on the MXU.
    fused = lax.dot_general(
        wf_ref[...], x,
        dimension_numbers=(((1,), (1,)), ((), ())),
        preferred_element_type=jnp.float32) + bf_ref[...]        # (Hp, TM)
    h = jnp.tanh(fused[0:hidden, :])                  # (H, TM)  lane-dense tanh (EUP)
    lin3 = fused[hidden:hidden + 1, :]                # (1, TM)

    # linear2:  (2, H) @ (H, TM) -> (2, TM)
    out = (jnp.dot(w2_ref[...], h, preferred_element_type=jnp.float32)
           + b2_ref[...])                             # (2, TM)
    mix = jax.nn.sigmoid(out[0:1, :])                 # (1, TM)

    dpre = mix * lin3                                 # (1, TM)
    delta = (dpre - ate) * a                          # (1, TM)
    y = jnp.maximum(out[1:2, :] - delta, 0.0)         # (1, TM) relu

    # Two direct lane-dense row stores (row 0 = y, row 1 = deltaPre).
    out_ref[0:1, :] = y
    out_ref[1:2, :] = dpre


def mixture_uplift_forward(x, A, params, ate, *, block_m=65536):
    """x: (M, D) f32, A: (M,) f32. Returns (y, deltaPre), each (M,) f32."""
    M, D = x.shape
    hidden = params["w1"].shape[1]

    # Tile size along M: multiple of 128, >=2 grid steps when M allows (v7x
    # megacore), capped so double-buffered f32 tiles (x + A + packed out) stay
    # well inside VMEM on every generation.
    bm = min(block_m, _round_up(pl.cdiv(M, 2), 128))
    bm = max(128, _round_up(bm, 128))
    per_row_bytes = 2 * 4 * (D + 1 + 2)            # double-buffered x + A + out rows
    vmem_budget = 40 << 20
    bm = min(bm, max(128, (vmem_budget // per_row_bytes) // 128 * 128))
    grid = (pl.cdiv(M, bm),)

    # Fuse linear1 + linear3 into one weight, padded to a multiple of 8 rows.
    w_fused = jnp.concatenate([params["w1"], params["w3"]], axis=1).T      # (H+1, D)
    b_fused = jnp.concatenate([params["b1"], params["b3"]], axis=1).T      # (H+1, 1)
    hp = _round_up(hidden + 1, 8)
    w_fused = jnp.pad(w_fused, ((0, hp - (hidden + 1)), (0, 0)))           # (Hp, D)
    b_fused = jnp.pad(b_fused, ((0, hp - (hidden + 1)), (0, 0)))           # (Hp, 1)
    w2_t = params["w2"].T                                                  # (2, H)
    b2_t = params["b2"].T                                                  # (2, 1)

    ate_arr = jnp.full((1, 1), ate, dtype=jnp.float32)
    a_row = A.astype(jnp.float32).reshape(1, M)     # tiny (4*M bytes), not padded

    weight_bytes = (hp * D + hp + 2 * hidden + 2) * 4
    vmem_need = per_row_bytes * bm + weight_bytes + (2 << 20)
    vmem_limit = int(min(max(vmem_need, 24 << 20), 48 << 20))

    kernel = functools.partial(mixture_uplift_kernel, hidden=hidden)

    def const_spec(shape):
        # Whole-array block, same block every grid step -> stays VMEM-resident.
        return pl.BlockSpec(shape, lambda i: (0, 0))

    packed = pl.pallas_call(
        kernel,
        grid=grid,
        out_shape=jax.ShapeDtypeStruct((2, M), jnp.float32),
        in_specs=[
            pl.BlockSpec(memory_space=pltpu.MemorySpace.SMEM),   # ate scalar
            pl.BlockSpec((bm, D), lambda i: (i, 0)),             # x, natural layout
            pl.BlockSpec((1, bm), lambda i: (0, i)),             # A row
            const_spec((hp, D)),                                 # fused W
            const_spec((hp, 1)),                                 # fused b
            const_spec((2, hidden)),                             # W2^T
            const_spec((2, 1)),                                  # b2^T
        ],
        out_specs=pl.BlockSpec((2, bm), lambda i: (0, i)),
        compiler_params=pltpu.CompilerParams(
            dimension_semantics=("parallel",),
            vmem_limit_bytes=vmem_limit),
    )(ate_arr, x, a_row, w_fused, b_fused, w2_t, b2_t)

    return packed[0], packed[1]


def init_params(key, input_size, hidden=24):
    """Deterministic parameter init mirroring the PyTorch module's shapes.

    Weights are stored as (in_features, out_features) — transposed vs. torch.
    linear.weight uses Xavier-normal (as in the module's __init__); the other
    layers use PyTorch's default uniform(-1/sqrt(fan_in), 1/sqrt(fan_in)).
    """
    k1, k2, k3, k4, k5, k6 = jax.random.split(key, 6)

    xavier_std = (2.0 / (input_size + hidden)) ** 0.5
    w1 = xavier_std * jax.random.normal(k1, (input_size, hidden), jnp.float32)
    b1_bound = 1.0 / (input_size ** 0.5)
    b1 = jax.random.uniform(k2, (1, hidden), jnp.float32, -b1_bound, b1_bound)

    w2_bound = 1.0 / (hidden ** 0.5)
    w2 = jax.random.uniform(k3, (hidden, 2), jnp.float32, -w2_bound, w2_bound)
    b2 = jax.random.uniform(k4, (1, 2), jnp.float32, -w2_bound, w2_bound)

    w3_bound = 1.0 / (input_size ** 0.5)
    w3 = jax.random.uniform(k5, (input_size, 1), jnp.float32, -w3_bound, w3_bound)
    b3 = jax.random.uniform(k6, (1, 1), jnp.float32, -w3_bound, w3_bound)

    return dict(w1=w1, b1=b1, w2=w2, b2=b2, w3=w3, b3=b3)


def reference_forward(x, A, params, ate):
    """Pure-JAX reference for correctness checking."""
    h = jnp.tanh(x @ params["w1"] + params["b1"])
    out = h @ params["w2"] + params["b2"]
    mix = jax.nn.sigmoid(out[:, 0])
    dpre = mix * (x @ params["w3"] + params["b3"])[:, 0]
    delta = (dpre - ate) * A
    y = jnp.maximum(out[:, 1] - delta, 0.0)
    return y, dpre


if __name__ == "__main__":
    M, D = 200, 16          # batch (non-multiple of 128 -> exercises tail masking), inputSize
    ATE = 0.05

    key = jax.random.PRNGKey(0)
    kx, ka, kp = jax.random.split(key, 3)

    x = jax.random.normal(kx, (M, D), jnp.float32)
    A = jax.random.bernoulli(ka, 0.5, (M,)).astype(jnp.float32)  # treatment flag
    params = init_params(kp, D)

    # Default bm selection gives bm=128, grid=(2,): exercises a multi-step grid
    # plus a masked tail block (rows 200..255 discarded).
    y, dpre = mixture_uplift_forward(x, A, params, ATE)
    jax.block_until_ready((y, dpre))

    y_ref, dpre_ref = reference_forward(x, A, params, ATE)
    assert y.shape == (M,) and dpre.shape == (M,)
    assert jnp.allclose(y, y_ref, atol=1e-5, rtol=1e-5)
    assert jnp.allclose(dpre, dpre_ref, atol=1e-5, rtol=1e-5)

    print("KERNEL_OK")
</pallas_src>

<mosaic_0001>
module attributes {stable_mosaic.version = 11 : i64} {
  func.func @mixture_uplift_kernel(%arg0: i32, %arg1: memref<1x1xf32, #tpu.memory_space<smem>>, %arg2: memref<128x16xf32, #tpu.memory_space<vmem>>, %arg3: memref<1x128xf32, #tpu.memory_space<vmem>>, %arg4: memref<32x16xf32, #tpu.memory_space<vmem>>, %arg5: memref<32x1xf32, #tpu.memory_space<vmem>>, %arg6: memref<2x24xf32, #tpu.memory_space<vmem>>, %arg7: memref<2x1xf32, #tpu.memory_space<vmem>>, %arg8: memref<2x128xf32, #tpu.memory_space<vmem>>) attributes {dimension_semantics = [#tpu.dimension_semantics<parallel>], iteration_bounds = array<i64: 2>, scalar_prefetch = 0 : i64, scratch_operands = 0 : i64, tpu.core_type = #tpu.core_type<tc>, window_params = [{transform_indices = @transform_0, window_bounds = array<i64: 1, 1>}, {transform_indices = @transform_1, window_bounds = array<i64: 128, 16>}, {transform_indices = @transform_2, window_bounds = array<i64: 1, 128>}, {pipeline_mode = #tpu.pipeline_mode<synchronous>, transform_indices = @transform_3, window_bounds = array<i64: 32, 16>}, {pipeline_mode = #tpu.pipeline_mode<synchronous>, transform_indices = @transform_4, window_bounds = array<i64: 32, 1>}, {pipeline_mode = #tpu.pipeline_mode<synchronous>, transform_indices = @transform_5, window_bounds = array<i64: 2, 24>}, {pipeline_mode = #tpu.pipeline_mode<synchronous>, transform_indices = @transform_6, window_bounds = array<i64: 2, 1>}, {transform_indices = @transform_7, window_bounds = array<i64: 2, 128>}]} {
    %c0 = arith.constant 0 : index
    %c0_0 = arith.constant 0 : index
    %0 = memref.load %arg1[%c0, %c0_0] : memref<1x1xf32, #tpu.memory_space<smem>>
    %c0_1 = arith.constant 0 : index
    %c0_2 = arith.constant 0 : index
    %1 = vector.load %arg2[%c0_1, %c0_2] : memref<128x16xf32, #tpu.memory_space<vmem>>, vector<128x16xf32>
    %c0_3 = arith.constant 0 : index
    %c0_4 = arith.constant 0 : index
    %2 = vector.load %arg3[%c0_3, %c0_4] : memref<1x128xf32, #tpu.memory_space<vmem>>, vector<1x128xf32>
    %c0_5 = arith.constant 0 : index
    %c0_6 = arith.constant 0 : index
    %3 = vector.load %arg4[%c0_5, %c0_6] : memref<32x16xf32, #tpu.memory_space<vmem>>, vector<32x16xf32>
    %cst = arith.constant dense<0.000000e+00> : vector<32x128xf32>
    %4 = tpu.matmul %3, %1, %cst {dimension_numbers = #tpu.dot_dimension_numbers<[1], [1], [0], [0], [0, 0, 1, 0], [], []>} : vector<32x16xf32>, vector<128x16xf32>, vector<32x128xf32> -> vector<32x128xf32>
    %c0_7 = arith.constant 0 : index
    %c0_8 = arith.constant 0 : index
    %5 = vector.load %arg5[%c0_7, %c0_8] : memref<32x1xf32, #tpu.memory_space<vmem>>, vector<32x1xf32>
    %6 = vector.broadcast %5 : vector<32x1xf32> to vector<32x128xf32>
    %7 = arith.addf %4, %6 : vector<32x128xf32>
    %8 = vector.extract_strided_slice %7 {offsets = [0, 0], sizes = [24, 128], strides = [1, 1]} : vector<32x128xf32> to vector<24x128xf32>
    %9 = math.tanh %8 : vector<24x128xf32>
    %10 = vector.extract_strided_slice %7 {offsets = [24, 0], sizes = [1, 128], strides = [1, 1]} : vector<32x128xf32> to vector<1x128xf32>
    %c0_9 = arith.constant 0 : index
    %c0_10 = arith.constant 0 : index
    %11 = vector.load %arg6[%c0_9, %c0_10] : memref<2x24xf32, #tpu.memory_space<vmem>>, vector<2x24xf32>
    %cst_11 = arith.constant dense<0.000000e+00> : vector<2x128xf32>
    %12 = tpu.matmul %11, %9, %cst_11 {dimension_numbers = #tpu.dot_dimension_numbers<[1], [0], [0], [1], [0, 0, 1, 1], [], []>} : vector<2x24xf32>, vector<24x128xf32>, vector<2x128xf32> -> vector<2x128xf32>
    %c0_12 = arith.constant 0 : index
    %c0_13 = arith.constant 0 : index
    %13 = vector.load %arg7[%c0_12, %c0_13] : memref<2x1xf32, #tpu.memory_space<vmem>>, vector<2x1xf32>
    %14 = vector.broadcast %13 : vector<2x1xf32> to vector<2x128xf32>
    %15 = arith.addf %12, %14 : vector<2x128xf32>
    %16 = vector.extract_strided_slice %15 {offsets = [0, 0], sizes = [1, 128], strides = [1, 1]} : vector<2x128xf32> to vector<1x128xf32>
    %17 = arith.negf %16 : vector<1x128xf32>
    %18 = math.exp %17 : vector<1x128xf32>
    %cst_14 = arith.constant 1.000000e+00 : f32
    %19 = vector.broadcast %cst_14 : f32 to vector<1x128xf32>
    %20 = arith.addf %19, %18 : vector<1x128xf32>
    %21 = arith.divf %19, %20 : vector<1x128xf32>
    %22 = arith.mulf %21, %10 : vector<1x128xf32>
    %23 = vector.broadcast %0 : f32 to vector<1x128xf32>
    %24 = arith.subf %22, %23 : vector<1x128xf32>
    %25 = arith.mulf %24, %2 : vector<1x128xf32>
    %26 = vector.extract_strided_slice %15 {offsets = [1, 0], sizes = [1, 128], strides = [1, 1]} : vector<2x128xf32> to vector<1x128xf32>
    %27 = arith.subf %26, %25 : vector<1x128xf32>
    %cst_15 = arith.constant 0.000000e+00 : f32
    %28 = vector.broadcast %cst_15 : f32 to vector<1x128xf32>
    %29 = arith.maximumf %27, %28 : vector<1x128xf32>
    %c0_16 = arith.constant 0 : index
    %c0_17 = arith.constant 0 : index
    %30 = vector.load %arg8[%c0_16, %c0_17] : memref<2x128xf32, #tpu.memory_space<vmem>>, vector<1x128xf32>
    tpu.vector_store %arg8[%c0_16, %c0_17], %29 {strides = array<i32>} : memref<2x128xf32, #tpu.memory_space<vmem>>, vector<1x128xf32>,
    %c1 = arith.constant 1 : index
    %c0_18 = arith.constant 0 : index
    %31 = vector.load %arg8[%c1, %c0_18] : memref<2x128xf32, #tpu.memory_space<vmem>>, vector<1x128xf32>
    tpu.vector_store %arg8[%c1, %c0_18], %22 {strides = array<i32>} : memref<2x128xf32, #tpu.memory_space<vmem>>, vector<1x128xf32>,
    return
  }
  func.func @transform_0(%arg0: i32) -> (i32, i32) {
    %c0_i32 = arith.constant 0 : i32
    %c0_i32_0 = arith.constant 0 : i32
    %c0_i32_1 = arith.constant 0 : i32
    return %c0_i32, %c0_i32_0 : i32, i32
  }
  func.func @transform_1(%arg0: i32) -> (i32, i32) {
    %c0_i32 = arith.constant 0 : i32
    %c0_i32_0 = arith.constant 0 : i32
    return %arg0, %c0_i32 : i32, i32
  }
  func.func @transform_2(%arg0: i32) -> (i32, i32) {
    %c0_i32 = arith.constant 0 : i32
    %c0_i32_0 = arith.constant 0 : i32
    return %c0_i32, %arg0 : i32, i32
  }
  func.func @transform_3(%arg0: i32) -> (i32, i32) {
    %c0_i32 = arith.constant 0 : i32
    %c0_i32_0 = arith.constant 0 : i32
    %c0_i32_1 = arith.constant 0 : i32
    return %c0_i32, %c0_i32_0 : i32, i32
  }
  func.func @transform_4(%arg0: i32) -> (i32, i32) {
    %c0_i32 = arith.constant 0 : i32
    %c0_i32_0 = arith.constant 0 : i32
    %c0_i32_1 = arith.constant 0 : i32
    return %c0_i32, %c0_i32_0 : i32, i32
  }
  func.func @transform_5(%arg0: i32) -> (i32, i32) {
    %c0_i32 = arith.constant 0 : i32
    %c0_i32_0 = arith.constant 0 : i32
    %c0_i32_1 = arith.constant 0 : i32
    return %c0_i32, %c0_i32_0 : i32, i32
  }
  func.func @transform_6(%arg0: i32) -> (i32, i32) {
    %c0_i32 = arith.constant 0 : i32
    %c0_i32_0 = arith.constant 0 : i32
    %c0_i32_1 = arith.constant 0 : i32
    return %c0_i32, %c0_i32_0 : i32, i32
  }
  func.func @transform_7(%arg0: i32) -> (i32, i32) {
    %c0_i32 = arith.constant 0 : i32
    %c0_i32_0 = arith.constant 0 : i32
    return %c0_i32, %arg0 : i32, i32
  }
}

</mosaic_0001>

<bundles_post_ra>
// kernel: tpu_custom_call.1
= control target key start
LH: loop header
LB: loop body
LE: loop exit
PB: predicated region body
PF: predicated region fallthrough
CT: control target
= control target key end

     0   :  { %s1205_s0 = inlined_call_operand.<no memory space> [shape: f32[1,1], index: 0, kind: input, shape index: {}]   ;;  %s1206_s1 = inlined_call_operand.vmem [shape: f32[200,16], index: 1, kind: input, shape index: {}]   ;;  %s1207_s2 = inlined_call_operand.vmem [shape: f32[1,200], index: 2, kind: input, shape index: {}]   ;;  %s1208_s3 = inlined_call_operand.vmem [shape: f32[32,16], index: 3, kind: input, shape index: {}]   ;;  %s1209_s4 = inlined_call_operand.vmem [shape: f32[32,1], index: 4, kind: input, shape index: {}]   ;;  %s1210_s5 = inlined_call_operand.vmem [shape: f32[2,24], index: 5, kind: input, shape index: {}]   ;;  %s1211_s6 = inlined_call_operand.vmem [shape: f32[2,1], index: 6, kind: input, shape index: {}]   ;;  %s1212_s7 = inlined_call_operand.hbm [shape: f32[2,200], index: 7, kind: output, shape index: {}]  }
   0x1   :  { %12 = sst [smem:[#allocation2]] %s1205_s0 }
   0x2   :  { %13 = vsyncpa [#allocation4], 0 }
   0x3   :  { %15 = vsyncpa [#allocation4 + $0x1], 0  ;;  %s1011_s26 = smov 0   ;;  %s1013_s27 = smov 0  }
   0x4   :  { %s1015_s28 = smov 0   ;;  %s1017_s29 = smov 0  }
   0x5 LB: > { %s1032_s0 = sadd.s32 4294967295, %s961_s29   ;;  %s689_s30 = sadd.s32 4294967294, %s961_s29   ;;  %s961_s29 = sphi %s1017_s29, %s1220_s29   ;;  %s957_s28 = sphi %s1015_s28, %s1219_s28   ;;  %s953_s27 = sphi %s1013_s27, %s1218_s27   ;;  %s949_s26 = sphi %s1011_s26, %s1217_s26  }
   0x6   : > { %s1036_s8 = sadd.s32 1, %s961_s29   ;;  %s185_s9 = sadd.s32 1, %s957_s28 }
   0x7   : > { %s182_s10 = ssub.s32 %s961_s29, %s1036_s8  ;;  %p195_p0 = scmp.ne.s32.totalorder %s957_s28, %s953_s27 }
   0x8   : > { %p183_p1 = scmp.eq.s32.totalorder %s182_s10, 0  ;;  %p196_p2 = scmp.eq.s32.totalorder %s1032_s0, 1 }
   0x9   : > { %p201_p3 = scmp.ne.s32.totalorder %s953_s27, %s949_s26  ;;  %p202_p4 = scmp.eq.s32.totalorder %s689_s30, 1 }
   0xa   : > { %s1047_s11 = scalar_select %p183_p1, %s957_s28, %s185_s9  }
   0xb   : > { %p1049_p5 = por %p196_p2, %p195_p0  ;;  %p1053_p6 = por %p202_p4, %p201_p3 }
   0xc   : > { %p692_p7 = scmp.ge.s32.totalorder %s961_s29, 1  ;;  %p258_p8 = scmp.lt.s32.totalorder %s961_s29, 3 }
   0xe   : > { %p259_p9 = pnand %p692_p7, %p258_p8 }
   0xf   : > { %s694_s14 = sshll.u32 (!%p259_p9), %s1032_s0, 4  ;;  %vm360_vm0 = vcmask (!%p259_p9), 130048   ;;  %v332_v0 = vld [vmem:[%s1208_s3] sm:$0xff] (!%p259_p9)  ;;  %v963_v1 = vmov (!%p259_p9), 0   ;;  %v338_v3 = vld [vmem:[%s1209_s4 + $0x10] sm:$0xff] (!%p259_p9)  ;;  %v337_v4 = vld [vmem:[%s1209_s4 + $0x8] sm:$0xff] (!%p259_p9) }
  0x10   : > { %262 = sbr.rel (%p259_p9) target bundleno = 592 (0x250), region = 48  ;;  %p302_p10 = scmp.lt.s32.totalorder (!%p259_p9), %s694_s14, 24  ;;  %778 = vmatprep.mubr.msk.f32.mxu0 (!%p259_p9), %vm360_vm0, %v332_v0  ;;  %887 = vset.pattern.permute.xlu0 (!%p259_p9), %v963_v1  ;;  %v336_v2 = vld [vmem:[%s1209_s4] sm:$0xff] (!%p259_p9)  ;;  %vm1083_vm1 = vmpackc.low (!%p259_p9), %vm360_vm0, %vm360_vm0  ;;  %v339_v7 = vld [vmem:[%s1209_s4 + $0x18] sm:$0xff] (!%p259_p9)  ;;  %v964_v35 = vmov (!%p259_p9), 0.0|0.0   ;;  %vm965_vm2 = vmmov (!%p259_p9), 0  }
  0x11   : > { %342 = vperm.xlu0 (!%p259_p9), %887, %v336_v2   ;;  %888 = vset.pattern.permute.xlu1 (!%p259_p9), %v963_v1  ;;  %v510_v5 = vld [vmem:[%s1211_s6] sm:$0x3] (!%p259_p9)  ;;  %v333_v32 = vld [vmem:[%s1208_s3 + $0x8] sm:$0xff] (!%p259_p9)  ;;  %v334_v33 = vld [vmem:[%s1208_s3 + $0x10] sm:$0xff] (!%p259_p9)  ;;  %v966_v36 = vmov (!%p259_p9), 0.0   ;;  %vm516_vm3 = vcmask (!%p259_p9), 195584  }
  0x12   : > { %352 = vperm.xlu1 (!%p259_p9), %888, %v338_v3   ;;  %v335_v34 = vld [vmem:[%s1208_s3 + $0x18] sm:$0xff] (!%p259_p9)  ;;  %841 = vmatprep.subr.bf16.mxu1 (!%p259_p9), %v964_v35  ;;  %v509_v51 = vld [vmem:[%s1210_s5] sm:$0x3] (!%p259_p9)  ;;  %p311_p11 = scmp.lt.s32.totalorder (!%p259_p9), %s1032_s0, 1  ;;  %s314_s24 = sld [smem:[#allocation2]] (!%p259_p9) }
  0x13   : > { %790 = vmatprep.mubr.msk.f32.mxu1 (!%p259_p9), %vm965_vm2, %v966_v36  ;;  %s719_s17 = sshll.u32 (!%p259_p9), %s1032_s0, 5 }
  0x14   : > { %s1163_s21 = scalar_lea.hbm (!%p259_p9), %s1212_s7, %s719_s17 }
  0x15   : > { %347 = vperm.xlu0 (!%p259_p9), %887, %v337_v4  }
  0x16   : > { %513 = vperm.xlu1 (!%p259_p9), %888, %v510_v5  }
  0x17   : > { %s1222_s14 = smov (!%p302_p10, %s694_s14), 24 }
  0x18   : > { %s695_s25 = sshll.u32 %s1222_s14, 3  ;;  %v597_v62 = vstv %s314_s24 }
  0x19   : > { %s1079_s10 = scalar_lea.vmem %s1206_s1, %s695_s25  ;;  %357 = vperm.xlu0 %887, %v339_v7   ;;  %s294_s25 = sand.u32 1, %s953_s27  }
  0x1a   : > { %v315_v8 = vld [vmem:[%s1079_s10] sm:$0xff]  ;;  %v316_v9 = vld [vmem:[%s1079_s10 + $0x8] sm:$0xff]  ;;  %v317_v10 = vld [vmem:[%s1079_s10 + $0x10] sm:$0xff]  ;;  %s312_s30 = scalar_select %p311_p11, %s1032_s0, 1 }
  0x1b   : > { %v793_v11 = vpack.c.bf16 %v316_v9, %v315_v8  ;;  %v318_v12 = vld [vmem:[%s1079_s10 + $0x18] sm:$0xff]  ;;  %v319_v14 = vld [vmem:[%s1079_s10 + $0x20] sm:$0xff]  ;;  %v320_v15 = vld [vmem:[%s1079_s10 + $0x28] sm:$0xff]  ;;  %s693_s9 = sshll.u32 %s294_s25, 1  ;;  %s608_s22 = scalar_lea.sflag [#allocation4], %s294_s25 }
  0x1c   : > { %v799_v13 = vpack.c.bf16 %v318_v12, %v317_v10  ;;  %v805_v16 = vpack.c.bf16 %v320_v15, %v319_v14  ;;  %v321_v17 = vld [vmem:[%s1079_s10 + $0x30] sm:$0xff]  ;;  %v322_v18 = vld [vmem:[%s1079_s10 + $0x38] sm:$0xff]  ;;  %v323_v20 = vld [vmem:[%s1079_s10 + $0x40] sm:$0xff]  ;;  %s313_s14 = scalar_lea.vmem %s1207_s2, %s312_s30  ;;  %s296_s16 = scalar_lea.vmem [#allocation3], %s693_s9 }
  0x1d   : > { %795 = vmatprep.subr.msk.bf16.mxu0 %vm1083_vm1, %v793_v11  ;;  %v811_v19 = vpack.c.bf16 %v322_v18, %v321_v17  ;;  %v324_v21 = vld [vmem:[%s1079_s10 + $0x48] sm:$0xff]  ;;  %v325_v23 = vld [vmem:[%s1079_s10 + $0x50] sm:$0xff]  ;;  %v326_v24 = vld [vmem:[%s1079_s10 + $0x58] sm:$0xff]  ;;  %s621_s18 = sshll.u32 %s296_s16, 4  ;;  %s967_s0 = smov [#allocation3]   ;;  %s1165_s18 = int_to_ptr.vmem [resolvable:$true] %s621_s18 }
  0x1e   : > { %798 = vmatpush3.bf16.xpose.msk.msra.mxu0 %vm1083_vm1, %v793_v11  ;;  %v817_v22 = vpack.c.bf16 %v324_v21, %v323_v20  ;;  %v823_v25 = vpack.c.bf16 %v326_v24, %v325_v23  ;;  %v327_v26 = vld [vmem:[%s1079_s10 + $0x60] sm:$0xff]  ;;  %v328_v27 = vld [vmem:[%s1079_s10 + $0x68] sm:$0xff]  ;;  %v329_v29 = vld [vmem:[%s1079_s10 + $0x70] sm:$0xff]  ;;  %s899_s23 = scalar_lea.vmem %s1165_s18, 32  ;;  %s903_s24 = sshll.u32 %s967_s0, 4  ;;  %s904_s24 = int_to_ptr.vmem [resolvable:$false] %s903_s24 }
  0x1f   : > { %801 = vmatprep.subr.msk.bf16.mxu0 %vm1083_vm1, %v799_v13  ;;  %v829_v28 = vpack.c.bf16 %v328_v27, %v327_v26  ;;  %v330_v30 = vld [vmem:[%s1079_s10 + $0x78] sm:$0xff]  ;;  %v331_v0 = vld [vmem:[%s313_s14] sm:$0x1]  ;;  %p900_p12 = scmp.ne.s32.totalorder %s1165_s18, %s899_s23  ;;  %s905_s30 = scalar_lea.vmem %s904_s24, 64 }
  0x20   : > { %v835_v31 = vpack.c.bf16 %v330_v30, %v329_v29  ;;  %p906_p1 = scmp.lt.s32.totalorder %s1165_s18, %s904_s24  ;;  %p907_p2 = scmp.lt.s32.totalorder %s905_s30, %s899_s23 }
  0x21   : > { %p901_p13 = pnand %p900_p12, %p1049_p5 }
  0x22   : > { %p908_p3 = por %p907_p2, %p906_p1 }
  0x23   : > { %p902_p0 = pneg %p901_p13 }
  0x25   : > { %p909_p4 = pnand %p908_p3, %p902_p0 }
  0x26   : > { %804 = vmatpush3.bf16.xpose.msk.msra.mxu0 %vm1083_vm1, %v799_v13 }
  0x27   : > { %807 = vmatprep.subr.msk.bf16.mxu0 %vm1083_vm1, %v805_v16 }
  0x2e   : > { %810 = vmatpush3.bf16.xpose.msk.msra.mxu0 %vm1083_vm1, %v805_v16 }
  0x2f   : > { %813 = vmatprep.subr.msk.bf16.mxu0 %vm1083_vm1, %v811_v19 }
  0x36   : > { %816 = vmatpush3.bf16.xpose.msk.msra.mxu0 %vm1083_vm1, %v811_v19 }
  0x37   : > { %819 = vmatprep.subr.msk.bf16.mxu0 %vm1083_vm1, %v817_v22 }
  0x3e   : > { %822 = vmatpush3.bf16.xpose.msk.msra.mxu0 %vm1083_vm1, %v817_v22 }
  0x3f   : > { %825 = vmatprep.subr.msk.bf16.mxu0 %vm1083_vm1, %v823_v25 }
  0x46   : > { %828 = vmatpush3.bf16.xpose.msk.msra.mxu0 %vm1083_vm1, %v823_v25 }
  0x47   : > { %831 = vmatprep.subr.msk.bf16.mxu0 %vm1083_vm1, %v829_v28 }
  0x4e   : > { %834 = vmatpush3.bf16.xpose.msk.msra.mxu0 %vm1083_vm1, %v829_v28 }
  0x4f   : > { %837 = vmatprep.subr.msk.bf16.mxu0 %vm1083_vm1, %v835_v31 }
  0x56   : > { %840 = vmatpush3.bf16.xpose.msk.msra.mxu0 %vm1083_vm1, %v835_v31 }
  0x5d   : > { %779 = vmatmul.mubr.msk.f32.vlgmr.msra.gmra.mrb[0].mxu0 %vm360_vm0, %v333_v32 }
  0x5e   : > { %781 = vmatprep.mubr.msk.f32.mxu0 %vm360_vm0, %v334_v33 }
  0x61   : > { %782 = vmatmul.mubr.msk.f32.gmra.mrb[2].mxu0 %vm360_vm0, %v335_v34 }
  0x90   : > { %v343_v37 = vpop.permute.xlu0 %342 }
  0x91   : > { %v353_v44 = vpop.permute.xlu1 %352 }
  0x94   : > { %v348_v38 = vpop.permute.xlu0 %347 }
  0x95   : > { %v514_v52 = vpop.permute.xlu1 %513 }
  0x98   : > { %v358_v59 = vpop.permute.xlu0 %357 }
 0x130   : > { %v780_v39 = vpop.f32.mrb[0].mxu0 }
 0x131   : > { %v493_v40 = vadd.f32 %v780_v39, %v348_v38  ;;  %v487_v41 = vpop.f32.mrb[1].mxu0 }
 0x132   : > { %v488_v42 = vadd.f32 %v487_v41, %v343_v37 }
 0x133   : > { %889 = vtanh.f32 %v493_v40 }
 0x134   : > { %891 = vtanh.f32 %v488_v42  ;;  %v783_v43 = vpop.f32.mrb[2].mxu0 }
 0x135   : > { %v497_v45 = vpop.f32.mrb[3].mxu0  ;;  %v503_v60 = vadd.f32 %v783_v43, %v358_v59 }
 0x136   : > { %v498_v46 = vadd.f32 %v497_v45, %v353_v44 }
 0x138   : > { %893 = vtanh.f32 %v498_v46 }
 0x13d   : > { %v890_v47 = vpop.eup %889 }
 0x13e   : > { %v892_v48 = vpop.eup %891 }
 0x13f   : > { %v842_v49 = vpack.c.bf16 %v890_v47, %v892_v48 }
 0x141   : > { %843 = vmatpush3.bf16.msra.mxu1 %v842_v49 }
 0x142   : > { %v894_v50 = vpop.eup %893  ;;  %788 = vmatprep.subr.mxu1 %v966_v36 }
 0x145   : > { %789 = vmatpush3.msra.mxu1 %v894_v50 }
 0x146   : > { %791 = vmatmul.mubr.msk.f32.vlgmr.msra.gmra.mrb[0].mxu1 %vm516_vm3, %v509_v51 }
 0x219   : > { %v586_v53 = vpop.f32.mrb[0].mxu1 }
 0x21a   : > { %v587_v54 = vadd.f32 %v586_v53, %v514_v52  ;;  %v792_v55 = vpop.f32.mrb[1].mxu1 }
 0x21c   : > { %v717_v56 = vmul.f32 -1.442695, %v587_v54 }
 0x21e   : > { %895 = vpow2.f32 %v717_v56 }
 0x228   : > { %v896_v57 = vpop.eup %895 }
 0x229   : > { %v593_v58 = vadd.f32 1.0, %v896_v57 }
 0x22b   : > { %897 = vrcp.f32 %v593_v58 }
 0x235   : > { %v898_v61 = vpop.eup %897 }
 0x236   : > { %v596_v63 = vmul.f32 %v898_v61, %v503_v60 }
 0x238   : > { %v598_v1 = vsub.f32 %v596_v63, %v597_v62  ;;  %606 = vst [vmem:[%s296_s16 + $0x1] sm:$0x1] %v596_v63 }
 0x23a   : > { %v599_v2 = vmul.f32 %v598_v1, %v331_v0 }
 0x23c   : > { %v601_v3 = vrot.slane %v599_v2, 7 }
 0x23e   : > { %v603_v4 = vsub.f32 %v587_v54, %v601_v3 }
 0x240   : > { %v604_v5 = vmax.f32 %v603_v4, 0.0 }
 0x242   : > { %605 = vst [vmem:[%s296_s16 - $0x1] sm:$0x2] %v604_v5 }
 0x243   : > { %912 = shalt.err (!%p909_p4)
}
 0x244   : > { %s913_s25 = scalar_lea.hbm %s1163_s21, 32  ;;  %s917_s15 = scalar_lea.hbm %s1212_s7, 64 }
 0x245   : > { %p914_p7 = scmp.ne.s32.totalorder %s1163_s21, %s913_s25  ;;  %p918_p10 = scmp.lt.u32.totalorder %s1163_s21, %s1212_s7 }
 0x246   : > { %p919_p11 = scmp.lt.u32.totalorder %s917_s15, %s913_s25  ;;  %p921_p13 = scmp.lt.u32.totalorder %s913_s25, %s1163_s21 }
 0x247   : > { %p915_p8 = pnand %p914_p7, %p1049_p5 }
 0x248   : > { %p920_p12 = por %p919_p11, %p918_p10 }
 0x249   : > { %p916_p9 = pneg %p915_p8 }
 0x24a   : > { %p922_p0 = por %p921_p13, %p920_p12 }
 0x24c   : > { %p923_p1 = pnand %p922_p0, %p916_p9 }
 0x24e   : > { %926 = shalt.err (!%p923_p1)
}
 0x24f   : > { %844 = dma.vmem_to_hbm [thread:$0]  (%p1049_p5), %s1165_s18, 32, %s1163_s21, %s608_s22  }
 0x250 PF: > { %p850_p2 = scmp.ge.s32.totalorder %s961_s29, 2  ;;  %s633_s17 = sand.u32 1, %s949_s26  }
 0x251   : > { %s634_s19 = scalar_lea.sflag [#allocation4], %s633_s17 }
 0x252   : > { %p847_p3 = pnand %p850_p2, %p1053_p6 }
 0x254   : > { %944 = dma.done.wait (!%p847_p3), %s634_s19, 32  }
 0x255   : > { %946 = vsyncadd (!%p847_p3), %s634_s19, 4294967264  ;;  %p18_p4 = scmp.ge.s32.totalorder %s1036_s8, 4   ;;  %s1217_s26 = smov %s953_s27 }
 0x256   : > { %s1218_s27 = smov %s957_s28  ;;  %s1219_s28 = smov %s1047_s11 }
 0x257   : > { %s1220_s29 = smov %s1036_s8  ;;  %20 = sbr.rel (!%p18_p4) target bundleno = 5 (0x5), region = 86 }
 0x25e   :  { %639 = vsyncpa [#allocation4], 1 }
 0x25f   :  { %641 = vsyncpa [#allocation4 + $0x1], 1 }

</bundles_post_ra>
